<compile_context>
chip_gen: v7x
topology: tpu7x:2x2x1
jax: 0.10.0
libtpu: 0.0.40
codegen_flags: <defaults>
</compile_context>

<pallas_src>
import jax
import jax.numpy as jnp
from jax.experimental import pallas as pl
from jax.experimental.pallas import tpu as pltpu


def _mymodel_kernel(x_ref, w_ref, s_ref, o_ref):
    # w_ref rows: 0 -> fc1 weight (1,W), 1 -> fc1 bias (1,W), 2 -> readout weight (1,W)
    # s_ref:      [0] -> muP scale (output_mult / width_mult), [1] -> readout bias
    w = w_ref[...]                                            # (3, W) single load
    # fc1 with indim == 1: (B,1) * (1,W) broadcast -> (B,W) on the VPU.
    h = x_ref[...] * w[0:1, :] + w[1:2, :]
    # readout with outdim == 1: VPU multiply + XLU lane reduce -> (B,1).
    y = jnp.sum(h * w[2:3, :], axis=-1, keepdims=True)
    # muP scale + bias applied on the tiny (B,1) result (free VALU slack).
    o_ref[...] = (y * s_ref[0] + s_ref[1]).astype(o_ref.dtype)


def prepare_params(w1, b1, w2, b2, *, output_mult=1.0, width_mult=1.0):
    """One-time parameter packing (NOT on the per-forward path).

    w1: (1, width)  fc1 weight (stored as (fan_in, fan_out))
    b1: (width,)    fc1 bias
    w2: (width, 1)  readout weight
    b2: (1,)        readout bias
    Returns (w_packed (3, width) f32, scalars (2,) f32).
    """
    width = w1.shape[1]
    w_packed = jnp.concatenate(
        [
            w1.reshape(1, width),
            b1.reshape(1, width),
            w2.reshape(1, width),
        ],
        axis=0,
    ).astype(jnp.float32)
    scalars = jnp.concatenate(
        [
            jnp.asarray([output_mult / width_mult], dtype=jnp.float32),
            b2.reshape(-1).astype(jnp.float32),
        ]
    )
    return w_packed, scalars


@jax.jit
def mymodel_forward(x, w_packed, scalars):
    """x: (B, 1) f32.  w_packed: (3, W) f32.  scalars: (2,) f32.  Returns (B, 1)."""
    batch = x.shape[0]
    vmem = pl.BlockSpec(memory_space=pltpu.MemorySpace.VMEM)
    smem = pl.BlockSpec(memory_space=pltpu.MemorySpace.SMEM)
    return pl.pallas_call(
        _mymodel_kernel,
        out_shape=jax.ShapeDtypeStruct((batch, 1), jnp.float32),
        in_specs=[vmem, vmem, smem],
        out_specs=vmem,
    )(x, w_packed, scalars)


def _torch_linear_init(key, fan_in, fan_out):
    """Deterministic stand-in for nn.Linear's default U(-1/sqrt(fan_in), ...)."""
    kw, kb = jax.random.split(key)
    bound = 1.0 / jnp.sqrt(jnp.float32(fan_in))
    # stored transposed: (fan_in, fan_out)
    w = jax.random.uniform(kw, (fan_in, fan_out), jnp.float32, -bound, bound)
    b = jax.random.uniform(kb, (fan_out,), jnp.float32, -bound, bound)
    return w, b


def reference_forward(x, w1, b1, w2, b2, output_mult=1.0, width_mult=1.0):
    h = x @ w1 + b1
    return (output_mult * h / width_mult) @ w2 + b2


if __name__ == "__main__":
    # Module defaults: indim=1, outdim=1; pick width=32, batch=8.
    batch, indim, width, outdim = 8, 1, 32, 1
    output_mult, width_mult = 1.0, 1.0

    key = jax.random.PRNGKey(0)
    k_x, k_fc1, k_ro = jax.random.split(key, 3)

    x = jax.random.normal(k_x, (batch, indim), dtype=jnp.float32)
    w1, b1 = _torch_linear_init(k_fc1, indim, width)    # fc1
    w2, b2 = _torch_linear_init(k_ro, width, outdim)    # MuReadout (Linear part)

    # One-time packing; the forward path below has zero host-side prep.
    w_packed, scalars = prepare_params(
        w1, b1, w2, b2, output_mult=output_mult, width_mult=width_mult
    )

    out = mymodel_forward(x, w_packed, scalars)
    out = jax.block_until_ready(out)

    ref = reference_forward(x, w1, b1, w2, b2, output_mult, width_mult)
    assert out.shape == (batch, outdim), out.shape
    assert jnp.allclose(out, ref, atol=1e-5, rtol=1e-5), (
        f"max err {jnp.max(jnp.abs(out - ref))}")

    print("KERNEL_OK")
</pallas_src>

<mosaic_0001>
module attributes {stable_mosaic.version = 11 : i64} {
  func.func @_mymodel_kernel(%arg0: memref<8x1xf32, #tpu.memory_space<vmem>>, %arg1: memref<3x32xf32, #tpu.memory_space<vmem>>, %arg2: memref<2xf32, #tpu.memory_space<smem>>, %arg3: memref<8x1xf32, #tpu.memory_space<vmem>>) attributes {dimension_semantics = [], scalar_prefetch = 0 : i64, scratch_operands = 0 : i64, tpu.core_type = #tpu.core_type<tc>} {
    %c0 = arith.constant 0 : index
    %c0_0 = arith.constant 0 : index
    %0 = vector.load %arg1[%c0, %c0_0] : memref<3x32xf32, #tpu.memory_space<vmem>>, vector<3x32xf32>
    %c0_1 = arith.constant 0 : index
    %c0_2 = arith.constant 0 : index
    %1 = vector.load %arg0[%c0_1, %c0_2] : memref<8x1xf32, #tpu.memory_space<vmem>>, vector<8x1xf32>
    %2 = vector.extract_strided_slice %0 {offsets = [0, 0], sizes = [1, 32], strides = [1, 1]} : vector<3x32xf32> to vector<1x32xf32>
    %3 = vector.broadcast %1 : vector<8x1xf32> to vector<8x32xf32>
    %4 = vector.broadcast %2 : vector<1x32xf32> to vector<8x32xf32>
    %5 = arith.mulf %3, %4 : vector<8x32xf32>
    %6 = vector.extract_strided_slice %0 {offsets = [1, 0], sizes = [1, 32], strides = [1, 1]} : vector<3x32xf32> to vector<1x32xf32>
    %7 = vector.broadcast %6 : vector<1x32xf32> to vector<8x32xf32>
    %8 = arith.addf %5, %7 : vector<8x32xf32>
    %9 = vector.extract_strided_slice %0 {offsets = [2, 0], sizes = [1, 32], strides = [1, 1]} : vector<3x32xf32> to vector<1x32xf32>
    %10 = vector.broadcast %9 : vector<1x32xf32> to vector<8x32xf32>
    %11 = arith.mulf %8, %10 : vector<8x32xf32>
    %cst = arith.constant dense<0.000000e+00> : vector<8xf32>
    %12 = vector.multi_reduction <add>, %11, %cst [1] : vector<8x32xf32> to vector<8xf32>
    %13 = vector.shape_cast %12 : vector<8xf32> to vector<8x1xf32>
    %c0_3 = arith.constant 0 : index
    %14 = memref.load %arg2[%c0_3] : memref<2xf32, #tpu.memory_space<smem>>
    %15 = vector.broadcast %14 : f32 to vector<8x1xf32>
    %16 = arith.mulf %13, %15 : vector<8x1xf32>
    %c1 = arith.constant 1 : index
    %17 = memref.load %arg2[%c1] : memref<2xf32, #tpu.memory_space<smem>>
    %18 = vector.broadcast %17 : f32 to vector<8x1xf32>
    %19 = arith.addf %16, %18 : vector<8x1xf32>
    %c0_4 = arith.constant 0 : index
    %c0_5 = arith.constant 0 : index
    %20 = vector.load %arg3[%c0_4, %c0_5] : memref<8x1xf32, #tpu.memory_space<vmem>>, vector<8x1xf32>
    tpu.vector_store %arg3[%c0_4, %c0_5], %19 {strides = array<i32>} : memref<8x1xf32, #tpu.memory_space<vmem>>, vector<8x1xf32>,
    return
  }
}

</mosaic_0001>

<bundles_post_ra>
// kernel: mymodel_forward.1
= control target key start
LH: loop header
LB: loop body
LE: loop exit
PB: predicated region body
PF: predicated region fallthrough
CT: control target
= control target key end

     0   :  { %8 = vsyncpa [#allocation3], 0  ;;  %s118_s0 = inlined_call_operand.vmem [shape: f32[8,1], index: 0, kind: input, shape index: {}]   ;;  %s119_s1 = inlined_call_operand.vmem [shape: f32[3,32], index: 1, kind: input, shape index: {}]   ;;  %s120_s2 = inlined_call_operand.vmem [shape: f32[2], index: 2, kind: input, shape index: {}]   ;;  %s121_s3 = inlined_call_operand.vmem [shape: f32[8,1], index: 3, kind: output, shape index: {}]  }
   0x1   :  { %s19_s14 = sshll.u32 %s120_s2, 4  ;;  %s20_s14 = int_to_ptr.vmem [resolvable:$true] %s19_s14 }
   0x2   :  { %s70_s15 = scalar_lea.vmem %s20_s14, 16  ;;  %p75_p1 = scmp.lt.s32.totalorder %s20_s14, %s20_s14 }
   0x3   :  { %p71_p0 = scmp.ne.s32.totalorder %s20_s14, %s70_s15  ;;  %p76_p2 = scmp.lt.s32.totalorder %s70_s15, %s70_s15 }
   0x5   :  { %p77_p3 = por %p76_p2, %p75_p1 }
   0x7   :  { %p78_p4 = pnand %p77_p3, %p71_p0 }
   0x9   :  { %81 = shalt.err (!%p78_p4)
}
   0xa   :  { %s84_s16 = smov [#allocation2]  }
   0xb   :  { %22 = dma.vmem_to_smem %s20_s14, 16, %s84_s16, [#allocation3]  }
   0xc   :  { %82 = dma.done.wait [#allocation3], 16  }
   0xd   :  { %83 = vsyncadd [#allocation3], 4294967280 }
   0xe   :  { %26 = sfence }
   0xf   :  { %v28_v0 = vld [vmem:[%s118_s0] sm:$0xff]  ;;  %v85_v1 = vmov 0   ;;  %v34_v2 = vlaneseq  ;;  %vm49_vm0 = vcmask 261120   ;;  %s53_s0 = sld [smem:[#allocation2]]  ;;  %s66_s20 = sld [smem:[#allocation2 + $0x1]]  ;;  %vm59_vm1 = vcmask 7168  }
  0x10   :  { %69 = vset.pattern.permute.xlu0 %v85_v1  ;;  %v27_v5 = vld [vmem:[%s119_s1] sm:$0x7] }
  0x11   :  { %31 = vperm.xlu0 %69, %v28_v0   ;;  %v35_v3 = vshrl.u32 %v34_v2, 7 }
  0x13   :  { %v36_v4 = vsub.s32 0, %v35_v3  ;;  %v41_v6 = vsub.s32 1, %v35_v3  ;;  %v46_v8 = vsub.s32 2, %v35_v3 }
  0x15   :  { %v37_v7 = vrot.slane %v27_v5, %v36_v4  ;;  %v42_v9 = vrot.slane %v27_v5, %v41_v6  ;;  %v47_v12 = vrot.slane %v27_v5, %v46_v8  ;;  %v54_v16 = vstv %s53_s0 }
  0x16   :  { %v57_v17 = vstv %s66_s20 }
  0x90   :  { %v32_v10 = vpop.permute.xlu0 %31 }
  0x91   :  { %v38_v11 = vmul.f32 %v37_v7, %v32_v10 }
  0x93   :  { %v43_v13 = vadd.f32 %v42_v9, %v38_v11 }
  0x95   :  { %v48_v14 = vmul.f32 %v47_v12, %v43_v13 }
  0x97   :  { %v50_v15 = vsel %vm49_vm0, %v48_v14, 0.0 }
  0x98   :  { %51 = vadd.xlane.f32.xlu0 %v50_v15 }
 0x125   :  { %v52_v18 = vpop.xlane.xlu0 %51 }
 0x126   :  { %v55_v19 = vmul.f32 %v54_v16, %v52_v18 }
 0x128   :  { %v58_v20 = vadd.f32 %v57_v17, %v55_v19 }
 0x12a   :  { %60 = vst.msk [vmem:[%s121_s3] sm:$0xff] %vm59_vm1, %v58_v20 }
 0x12b   :  { %65 = vsyncpa [#allocation3], 1 }

</bundles_post_ra>
